<compile_context>
chip_gen: v5e
topology: v5e:2x2
jax: 0.10.0
libtpu: 0.0.40
codegen_flags: <defaults>
</compile_context>

<pallas_src>
import jax
import jax.numpy as jnp
from jax.experimental import pallas as pl
from jax.experimental.pallas import tpu as pltpu

MAX_TM = 16384  # rows of x per grid step (~2 MiB f32 at Cin=32); ~12-14 MiB peak VMEM w/ H=64


def degree_decoder_kernel(x_ref, w1_ref, b1_ref, w2_ref, b2_ref, o_ref):
    # Layer 1: [tm, Cin] @ [Cin, H] -> [tm, H] on the MXU; bias + ReLU on the VPU.
    h = jnp.dot(x_ref[...], w1_ref[...], preferred_element_type=jnp.float32)
    h = jnp.maximum(h + b1_ref[...], 0.0)           # b1 is [1, H], sublane-broadcast

    # Layer 2: [tm, H] @ [H, Cout] -> [tm, Cout]; bias + ReLU.
    y = jnp.dot(h, w2_ref[...], preferred_element_type=jnp.float32)
    y = jnp.maximum(y + b2_ref[...], 0.0)           # b2 is [1, Cout]
    o_ref[...] = y.astype(o_ref.dtype)


def degree_decoder(x, w1, b1, w2, b2):
    """Eval-mode DegreeDecoder forward.

    x:  [N, Cin]   float32
    w1: [Cin, H]   (transposed vs. torch Linear.weight)
    b1: [H]
    w2: [H, Cout]  (transposed vs. torch Linear.weight)
    b2: [Cout]
    returns [N, Cout]
    """
    N, Cin = x.shape
    H = w1.shape[1]
    Cout = w2.shape[1]

    # Sublane tile over N: multiple of 8, capped at MAX_TM; cdiv handles the partial tail.
    tm = min(MAX_TM, ((N + 7) // 8) * 8)
    grid = (pl.cdiv(N, tm),)

    b1r = b1.reshape(1, H)
    b2r = b2.reshape(1, Cout)

    out = pl.pallas_call(
        degree_decoder_kernel,
        out_shape=jax.ShapeDtypeStruct((N, Cout), x.dtype),
        grid_spec=pltpu.PrefetchScalarGridSpec(
            num_scalar_prefetch=0,
            grid=grid,
            in_specs=[
                pl.BlockSpec((tm, Cin), lambda i: (i, 0)),    # x row-tile (natural layout)
                pl.BlockSpec((Cin, H), lambda i: (0, 0)),     # w1 (VMEM-resident, ~8 KiB)
                pl.BlockSpec((1, H), lambda i: (0, 0)),       # b1 row
                pl.BlockSpec((H, Cout), lambda i: (0, 0)),    # w2
                pl.BlockSpec((1, Cout), lambda i: (0, 0)),    # b2 row
            ],
            out_specs=pl.BlockSpec((tm, Cout), lambda i: (i, 0)),
        ),
        compiler_params=pltpu.CompilerParams(
            dimension_semantics=("parallel",),
            vmem_limit_bytes=32 * 1024 * 1024,   # covers x double-buffer + [tm, H] f32 temps
        ),
    )(x, w1, b1r, w2, b2r)

    return out


def reference(x, w1, b1, w2, b2):
    h = jnp.maximum(x @ w1 + b1, 0.0)
    return jnp.maximum(h @ w2 + b2, 0.0)


if __name__ == "__main__":
    # DegreeDecoder(in_channels=32, hidden_channels=[64], out_channels=1, num_layers=2)
    N, Cin, H, Cout = 128, 32, 64, 1

    key = jax.random.PRNGKey(0)
    kx, kw1, kb1, kw2, kb2 = jax.random.split(key, 5)

    x = jax.random.normal(kx, (N, Cin), dtype=jnp.float32)

    # Deterministic init (roughly matching PyTorch Linear's uniform scale).
    bound1 = 1.0 / jnp.sqrt(Cin)
    w1 = jax.random.uniform(kw1, (Cin, H), minval=-bound1, maxval=bound1, dtype=jnp.float32)
    b1 = jax.random.uniform(kb1, (H,), minval=-bound1, maxval=bound1, dtype=jnp.float32)
    bound2 = 1.0 / jnp.sqrt(H)
    w2 = jax.random.uniform(kw2, (H, Cout), minval=-bound2, maxval=bound2, dtype=jnp.float32)
    b2 = jax.random.uniform(kb2, (Cout,), minval=-bound2, maxval=bound2, dtype=jnp.float32)

    out = jax.block_until_ready(degree_decoder(x, w1, b1, w2, b2))
    ref = reference(x, w1, b1, w2, b2)
    assert out.shape == (N, Cout)
    assert jnp.allclose(out, ref, atol=1e-5, rtol=1e-5)

    # Exercise the partial-last-block path (N not a multiple of 8/128).
    N2 = 200
    x2 = jax.random.normal(jax.random.PRNGKey(1), (N2, Cin), dtype=jnp.float32)
    out2 = jax.block_until_ready(degree_decoder(x2, w1, b1, w2, b2))
    ref2 = reference(x2, w1, b1, w2, b2)
    assert out2.shape == (N2, Cout)
    assert jnp.allclose(out2, ref2, atol=1e-5, rtol=1e-5)

    # TODO(synk): training-mode dropout (nn.Dropout(0.5)) not implemented; kernel is eval-mode.
    print("KERNEL_OK")
</pallas_src>

<mosaic_0001>
module attributes {stable_mosaic.version = 11 : i64} {
  func.func @degree_decoder_kernel(%arg0: i32, %arg1: memref<128x32xf32, #tpu.memory_space<vmem>>, %arg2: memref<32x64xf32, #tpu.memory_space<vmem>>, %arg3: memref<1x64xf32, #tpu.memory_space<vmem>>, %arg4: memref<64x1xf32, #tpu.memory_space<vmem>>, %arg5: memref<1x1xf32, #tpu.memory_space<vmem>>, %arg6: memref<128x1xf32, #tpu.memory_space<vmem>>) attributes {dimension_semantics = [#tpu.dimension_semantics<parallel>], iteration_bounds = array<i64: 1>, scalar_prefetch = 0 : i64, scratch_operands = 0 : i64, tpu.core_type = #tpu.core_type<tc>, window_params = [{transform_indices = @transform_0, window_bounds = array<i64: 128, 32>}, {pipeline_mode = #tpu.pipeline_mode<synchronous>, transform_indices = @transform_1, window_bounds = array<i64: 32, 64>}, {pipeline_mode = #tpu.pipeline_mode<synchronous>, transform_indices = @transform_2, window_bounds = array<i64: 1, 64>}, {pipeline_mode = #tpu.pipeline_mode<synchronous>, transform_indices = @transform_3, window_bounds = array<i64: 64, 1>}, {pipeline_mode = #tpu.pipeline_mode<synchronous>, transform_indices = @transform_4, window_bounds = array<i64: 1, 1>}, {transform_indices = @transform_5, window_bounds = array<i64: 128, 1>}]} {
    %c0 = arith.constant 0 : index
    %c0_0 = arith.constant 0 : index
    %0 = vector.load %arg1[%c0, %c0_0] : memref<128x32xf32, #tpu.memory_space<vmem>>, vector<128x32xf32>
    %c0_1 = arith.constant 0 : index
    %c0_2 = arith.constant 0 : index
    %1 = vector.load %arg2[%c0_1, %c0_2] : memref<32x64xf32, #tpu.memory_space<vmem>>, vector<32x64xf32>
    %cst = arith.constant dense<0.000000e+00> : vector<128x64xf32>
    %2 = tpu.matmul %0, %1, %cst {dimension_numbers = #tpu.dot_dimension_numbers<[1], [0], [0], [1], [0, 0, 1, 1], [], []>} : vector<128x32xf32>, vector<32x64xf32>, vector<128x64xf32> -> vector<128x64xf32>
    %c0_3 = arith.constant 0 : index
    %c0_4 = arith.constant 0 : index
    %3 = vector.load %arg3[%c0_3, %c0_4] : memref<1x64xf32, #tpu.memory_space<vmem>>, vector<1x64xf32>
    %4 = vector.broadcast %3 : vector<1x64xf32> to vector<128x64xf32>
    %5 = arith.addf %2, %4 : vector<128x64xf32>
    %cst_5 = arith.constant 0.000000e+00 : f32
    %6 = vector.broadcast %cst_5 : f32 to vector<128x64xf32>
    %7 = arith.maximumf %5, %6 : vector<128x64xf32>
    %c0_6 = arith.constant 0 : index
    %c0_7 = arith.constant 0 : index
    %8 = vector.load %arg4[%c0_6, %c0_7] : memref<64x1xf32, #tpu.memory_space<vmem>>, vector<64x1xf32>
    %cst_8 = arith.constant dense<0.000000e+00> : vector<128x1xf32>
    %9 = tpu.matmul %7, %8, %cst_8 {dimension_numbers = #tpu.dot_dimension_numbers<[1], [0], [0], [1], [0, 0, 1, 1], [], []>} : vector<128x64xf32>, vector<64x1xf32>, vector<128x1xf32> -> vector<128x1xf32>
    %c0_9 = arith.constant 0 : index
    %c0_10 = arith.constant 0 : index
    %10 = vector.load %arg5[%c0_9, %c0_10] : memref<1x1xf32, #tpu.memory_space<vmem>>, vector<1x1xf32>
    %11 = vector.broadcast %10 : vector<1x1xf32> to vector<128x1xf32>
    %12 = arith.addf %9, %11 : vector<128x1xf32>
    %cst_11 = arith.constant 0.000000e+00 : f32
    %13 = vector.broadcast %cst_11 : f32 to vector<128x1xf32>
    %14 = arith.maximumf %12, %13 : vector<128x1xf32>
    %c0_12 = arith.constant 0 : index
    %c0_13 = arith.constant 0 : index
    %15 = vector.load %arg6[%c0_12, %c0_13] : memref<128x1xf32, #tpu.memory_space<vmem>>, vector<128x1xf32>
    tpu.vector_store %arg6[%c0_12, %c0_13], %14 {strides = array<i32>} : memref<128x1xf32, #tpu.memory_space<vmem>>, vector<128x1xf32>,
    return
  }
  func.func @transform_0(%arg0: i32) -> (i32, i32) {
    %c0_i32 = arith.constant 0 : i32
    %c0_i32_0 = arith.constant 0 : i32
    return %arg0, %c0_i32 : i32, i32
  }
  func.func @transform_1(%arg0: i32) -> (i32, i32) {
    %c0_i32 = arith.constant 0 : i32
    %c0_i32_0 = arith.constant 0 : i32
    %c0_i32_1 = arith.constant 0 : i32
    return %c0_i32, %c0_i32_0 : i32, i32
  }
  func.func @transform_2(%arg0: i32) -> (i32, i32) {
    %c0_i32 = arith.constant 0 : i32
    %c0_i32_0 = arith.constant 0 : i32
    %c0_i32_1 = arith.constant 0 : i32
    return %c0_i32, %c0_i32_0 : i32, i32
  }
  func.func @transform_3(%arg0: i32) -> (i32, i32) {
    %c0_i32 = arith.constant 0 : i32
    %c0_i32_0 = arith.constant 0 : i32
    %c0_i32_1 = arith.constant 0 : i32
    return %c0_i32, %c0_i32_0 : i32, i32
  }
  func.func @transform_4(%arg0: i32) -> (i32, i32) {
    %c0_i32 = arith.constant 0 : i32
    %c0_i32_0 = arith.constant 0 : i32
    %c0_i32_1 = arith.constant 0 : i32
    return %c0_i32, %c0_i32_0 : i32, i32
  }
  func.func @transform_5(%arg0: i32) -> (i32, i32) {
    %c0_i32 = arith.constant 0 : i32
    %c0_i32_0 = arith.constant 0 : i32
    return %arg0, %c0_i32 : i32, i32
  }
}

</mosaic_0001>

<bundles_post_ra>
// kernel: tpu_custom_call.1
= control target key start
LH: loop header
LB: loop body
LE: loop exit
PB: predicated region body
PF: predicated region fallthrough
CT: control target
= control target key end

     0   :  { %vm46_vm0 = vcmask 261120   ;;  %vm188_vm1 = vcmask 523264   ;;  %vm318_vm2 = vcmask 7168   ;;  %s637_s1 = inlined_call_operand.vmem [shape: f32[32,64], index: 1, kind: input, shape index: {}]   ;;  %s638_s0 = inlined_call_operand.vmem [shape: f32[128,32], index: 0, kind: input, shape index: {}]   ;;  %s639_s2 = inlined_call_operand.vmem [shape: f32[1,64], index: 2, kind: input, shape index: {}]   ;;  %s640_s3 = inlined_call_operand.vmem [shape: f32[64,1], index: 3, kind: input, shape index: {}]   ;;  %s641_s4 = inlined_call_operand.<no memory space> [shape: f32[1,1], index: 4, kind: input, shape index: {}]   ;;  %s642_s5 = inlined_call_operand.vmem [shape: f32[128,1], index: 5, kind: output, shape index: {}]  }
   0x1   :  { %v41_v0 = vld [vmem:[%s637_s1 + $0x18] sm:$0xff]  ;;  %v40_v1 = vld [vmem:[%s637_s1 + $0x10] sm:$0xff]  ;;  %v39_v2 = vld [vmem:[%s637_s1 + $0x8] sm:$0xff] }
   0x2   :  { %107 = vmatpush.msra.mxu0 %v41_v0  ;;  %371 = vmatpush.msra.mxu3 %v41_v0  ;;  %v38_v3 = vld [vmem:[%s637_s1] sm:$0xff]  ;;  %v23_v5 = vld [vmem:[%s638_s0 + $0x8] sm:$0xff]  ;;  %v24_v6 = vld [vmem:[%s638_s0 + $0x10] sm:$0xff] }
   0x3   :  { %v22_v4 = vld [vmem:[%s638_s0] sm:$0xff]  ;;  %v25_v7 = vld [vmem:[%s638_s0 + $0x18] sm:$0xff]  ;;  %v31_v9 = vld [vmem:[%s638_s0 + $0x48] sm:$0xff] }
   0x4   :  { %108 = vmatpush.msra.mxu0 %v40_v1  ;;  %372 = vmatpush.msra.mxu3 %v40_v1  ;;  %v26_v8 = vld [vmem:[%s638_s0 + $0x20] sm:$0xff]  ;;  %v27_v10 = vld [vmem:[%s638_s0 + $0x28] sm:$0xff]  ;;  %v32_v11 = vld [vmem:[%s638_s0 + $0x50] sm:$0xff] }
   0x5   :  { %v28_v12 = vld [vmem:[%s638_s0 + $0x30] sm:$0xff]  ;;  %v33_v13 = vld [vmem:[%s638_s0 + $0x58] sm:$0xff]  ;;  %v181_v16 = vld [vmem:[%s640_s3 + $0x28] sm:$0xff] }
   0x6   :  { %109 = vmatpush.msra.mxu0 %v39_v2  ;;  %373 = vmatpush.msra.mxu3 %v39_v2  ;;  %v183_v14 = vld [vmem:[%s640_s3 + $0x38] sm:$0xff]  ;;  %v182_v15 = vld [vmem:[%s640_s3 + $0x30] sm:$0xff]  ;;  %v180_v18 = vld [vmem:[%s640_s3 + $0x20] sm:$0xff]  ;;  %v10_v2 = vstv %s641_s4 }
   0x7   :  { %245 = vmatpush.msra.mxu1 %v183_v14  ;;  %375 = vmatpush.msra.mxu2 %v183_v14  ;;  %v29_v17 = vld [vmem:[%s638_s0 + $0x38] sm:$0xff]  ;;  %v34_v19 = vld [vmem:[%s638_s0 + $0x60] sm:$0xff]  ;;  %v35_v22 = vld [vmem:[%s638_s0 + $0x68] sm:$0xff]  ;;  %11 = vst [vmem:[#allocation2] sm:$0x1] %v10_v2 }
   0x8   :  { %110 = vmatpush.msra.mxu0 %v38_v3  ;;  %374 = vmatpush.msra.mxu3 %v38_v3  ;;  %v179_v20 = vld [vmem:[%s640_s3 + $0x18] sm:$0xff]  ;;  %v30_v21 = vld [vmem:[%s638_s0 + $0x40] sm:$0xff]  ;;  %v36_v23 = vld [vmem:[%s638_s0 + $0x70] sm:$0xff] }
   0x9   :  { %339 = vmatmul.msk.f32.vlgmr.msra.gmra.mxu0 %vm46_vm0, %v22_v4  ;;  %348 = vmatmul.msk.f32.vlgmr.msra.gmra.mxu3 %vm46_vm0, %v31_v9  ;;  %v37_v24 = vld [vmem:[%s638_s0 + $0x78] sm:$0xff]  ;;  %v178_v25 = vld [vmem:[%s640_s3 + $0x10] sm:$0xff]  ;;  %v177_v26 = vld [vmem:[%s640_s3 + $0x8] sm:$0xff] }
   0xa   :  { %246 = vmatpush.msra.mxu1 %v182_v15  ;;  %376 = vmatpush.msra.mxu2 %v182_v15  ;;  %v176_v27 = vld [vmem:[%s640_s3] sm:$0xff] }
   0xb   :  { %v518_v28 = vld [vmem:[%s639_s2] ss:$0 sm:$0xff] }
   0xc   :  { %247 = vmatpush.msra.mxu1 %v181_v16  ;;  %377 = vmatpush.msra.mxu2 %v181_v16 }
   0xe   :  { %248 = vmatpush.msra.mxu1 %v180_v18  ;;  %378 = vmatpush.msra.mxu2 %v180_v18  ;;  %v555_v14 = vld [vmem:[#allocation2] ss:$0 sm:$0xff] }
  0x10   :  { %249 = vmatpush.msra.mxu1 %v179_v20  ;;  %379 = vmatpush.msra.mxu2 %v179_v20 }
  0x11   :  { %340 = vmatmul.msk.f32.gmra.mxu0 %vm46_vm0, %v23_v5  ;;  %349 = vmatmul.msk.f32.gmra.mxu3 %vm46_vm0, %v32_v11 }
  0x12   :  { %250 = vmatpush.msra.mxu1 %v178_v25  ;;  %380 = vmatpush.msra.mxu2 %v178_v25 }
  0x14   :  { %251 = vmatpush.msra.mxu1 %v177_v26  ;;  %381 = vmatpush.msra.mxu2 %v177_v26 }
  0x16   :  { %252 = vmatpush.msra.mxu1 %v176_v27  ;;  %382 = vmatpush.msra.mxu2 %v176_v27 }
  0x19   :  { %341 = vmatmul.msk.f32.gmra.mxu0 %vm46_vm0, %v24_v6  ;;  %350 = vmatmul.msk.f32.gmra.mxu3 %vm46_vm0, %v33_v13 }
  0x21   :  { %342 = vmatmul.msk.f32.gmra.mxu0 %vm46_vm0, %v25_v7  ;;  %351 = vmatmul.msk.f32.gmra.mxu3 %vm46_vm0, %v34_v19 }
  0x29   :  { %343 = vmatmul.msk.f32.gmra.mxu0 %vm46_vm0, %v26_v8  ;;  %352 = vmatmul.msk.f32.gmra.mxu3 %vm46_vm0, %v35_v22 }
  0x31   :  { %344 = vmatmul.msk.f32.gmra.mxu0 %vm46_vm0, %v27_v10  ;;  %353 = vmatmul.msk.f32.gmra.mxu3 %vm46_vm0, %v36_v23 }
  0x39   :  { %345 = vmatmul.msk.f32.gmra.mxu0 %vm46_vm0, %v28_v12  ;;  %354 = vmatmul.msk.f32.gmra.mxu3 %vm46_vm0, %v37_v24 }
  0x41   :  { %346 = vmatmul.msk.f32.gmra.mxu0 %vm46_vm0, %v29_v17 }
  0x49   :  { %347 = vmatmul.msk.f32.gmra.mxu0 %vm46_vm0, %v30_v21 }
  0x86   :  { %v112_v29 = vpop.f32.mrf.mxu0 }
  0x87   :  { %v113_v30 = vadd.f32 %v518_v28, %v112_v29 }
  0x89   :  { %v160_v31 = vmax.f32 %v113_v30, 0.0 }
  0x8b   :  { %355 = vmatmul.msk.f32.vlgmr.msra.gmra.mxu1 %vm188_vm1, %v160_v31 }
  0x8c   :  { %v139_v50 = vpop.f32.mrf.mxu3 }
  0x8d   :  { %v140_v58 = vadd.f32 %v518_v28, %v139_v50 }
  0x8e   :  { %v115_v32 = vpop.f32.mrf.mxu0 }
  0x8f   :  { %v116_v33 = vadd.f32 %v518_v28, %v115_v32  ;;  %v169_v59 = vmax.f32 %v140_v58, 0.0 }
  0x91   :  { %v161_v34 = vmax.f32 %v116_v33, 0.0 }
  0x93   :  { %356 = vmatmul.msk.f32.gmra.mxu1 %vm188_vm1, %v161_v34 }
  0x94   :  { %v142_v55 = vpop.f32.mrf.mxu3 }
  0x95   :  { %v143_v61 = vadd.f32 %v518_v28, %v142_v55 }
  0x96   :  { %v118_v35 = vpop.f32.mrf.mxu0 }
  0x97   :  { %v119_v36 = vadd.f32 %v518_v28, %v118_v35  ;;  %v170_v62 = vmax.f32 %v143_v61, 0.0 }
  0x99   :  { %v162_v37 = vmax.f32 %v119_v36, 0.0 }
  0x9b   :  { %357 = vmatmul.msk.f32.gmra.mxu1 %vm188_vm1, %v162_v37 }
  0x9c   :  { %v145_v60 = vpop.f32.mrf.mxu3 }
  0x9d   :  { %v146_v0 = vadd.f32 %v518_v28, %v145_v60 }
  0x9e   :  { %v121_v38 = vpop.f32.mrf.mxu0 }
  0x9f   :  { %v122_v39 = vadd.f32 %v518_v28, %v121_v38  ;;  %v171_v1 = vmax.f32 %v146_v0, 0.0 }
  0xa1   :  { %v163_v40 = vmax.f32 %v122_v39, 0.0 }
  0xa3   :  { %358 = vmatmul.msk.f32.gmra.mxu1 %vm188_vm1, %v163_v40 }
  0xa4   :  { %v148_v63 = vpop.f32.mrf.mxu3 }
  0xa5   :  { %v149_v3 = vadd.f32 %v518_v28, %v148_v63 }
  0xa6   :  { %v124_v41 = vpop.f32.mrf.mxu0 }
  0xa7   :  { %v125_v42 = vadd.f32 %v518_v28, %v124_v41  ;;  %v172_v5 = vmax.f32 %v149_v3, 0.0 }
  0xa9   :  { %v164_v43 = vmax.f32 %v125_v42, 0.0 }
  0xab   :  { %359 = vmatmul.msk.f32.gmra.mxu1 %vm188_vm1, %v164_v43 }
  0xac   :  { %v151_v4 = vpop.f32.mrf.mxu3 }
  0xad   :  { %v152_v6 = vadd.f32 %v518_v28, %v151_v4 }
  0xae   :  { %v127_v44 = vpop.f32.mrf.mxu0 }
  0xaf   :  { %v128_v45 = vadd.f32 %v518_v28, %v127_v44  ;;  %v173_v8 = vmax.f32 %v152_v6, 0.0 }
  0xb1   :  { %v165_v46 = vmax.f32 %v128_v45, 0.0 }
  0xb3   :  { %360 = vmatmul.msk.f32.gmra.mxu1 %vm188_vm1, %v165_v46 }
  0xb4   :  { %v154_v7 = vpop.f32.mrf.mxu3 }
  0xb5   :  { %v155_v9 = vadd.f32 %v518_v28, %v154_v7 }
  0xb6   :  { %v130_v47 = vpop.f32.mrf.mxu0 }
  0xb7   :  { %v131_v48 = vadd.f32 %v518_v28, %v130_v47  ;;  %v174_v10 = vmax.f32 %v155_v9, 0.0 }
  0xb9   :  { %v166_v49 = vmax.f32 %v131_v48, 0.0 }
  0xbb   :  { %361 = vmatmul.msk.f32.gmra.mxu1 %vm188_vm1, %v166_v49 }
  0xbc   :  { %v157_v11 = vpop.f32.mrf.mxu3 }
  0xbd   :  { %v158_v12 = vadd.f32 %v518_v28, %v157_v11 }
  0xbe   :  { %v133_v51 = vpop.f32.mrf.mxu0 }
  0xbf   :  { %v134_v52 = vadd.f32 %v518_v28, %v133_v51  ;;  %v175_v13 = vmax.f32 %v158_v12, 0.0 }
  0xc1   :  { %v167_v53 = vmax.f32 %v134_v52, 0.0 }
  0xc3   :  { %362 = vmatmul.msk.f32.gmra.mxu1 %vm188_vm1, %v167_v53 }
  0xc6   :  { %v136_v54 = vpop.f32.mrf.mxu0 }
  0xc7   :  { %v137_v56 = vadd.f32 %v518_v28, %v136_v54 }
  0xc9   :  { %v168_v57 = vmax.f32 %v137_v56, 0.0 }
  0xcb   :  { %363 = vmatmul.msk.f32.vlgmr.msra.gmra.mxu2 %vm188_vm1, %v168_v57 }
  0xd3   :  { %364 = vmatmul.msk.f32.gmra.mxu2 %vm188_vm1, %v169_v59 }
  0xdb   :  { %365 = vmatmul.msk.f32.gmra.mxu2 %vm188_vm1, %v170_v62 }
  0xe3   :  { %366 = vmatmul.msk.f32.gmra.mxu2 %vm188_vm1, %v171_v1 }
  0xeb   :  { %367 = vmatmul.msk.f32.gmra.mxu2 %vm188_vm1, %v172_v5 }
  0xf3   :  { %368 = vmatmul.msk.f32.gmra.mxu2 %vm188_vm1, %v173_v8 }
  0xfb   :  { %369 = vmatmul.msk.f32.gmra.mxu2 %vm188_vm1, %v174_v10 }
 0x103   :  { %370 = vmatmul.msk.f32.gmra.mxu2 %vm188_vm1, %v175_v13 }
 0x108   :  { %v254_v15 = vpop.f32.mrf.mxu1 }
 0x109   :  { %v255_v16 = vadd.f32 %v555_v14, %v254_v15 }
 0x10b   :  { %v302_v17 = vmax.f32 %v255_v16, 0.0 }
 0x10d   :  { %319 = vst.msk [vmem:[%s642_s5] sm:$0xff] %vm318_vm2, %v302_v17 }
 0x110   :  { %v257_v18 = vpop.f32.mrf.mxu1 }
 0x111   :  { %v258_v19 = vadd.f32 %v555_v14, %v257_v18 }
 0x113   :  { %v303_v20 = vmax.f32 %v258_v19, 0.0 }
 0x115   :  { %320 = vst.msk [vmem:[%s642_s5 + $0x8] sm:$0xff] %vm318_vm2, %v303_v20 }
 0x118   :  { %v260_v21 = vpop.f32.mrf.mxu1 }
 0x119   :  { %v261_v22 = vadd.f32 %v555_v14, %v260_v21 }
 0x11b   :  { %v304_v23 = vmax.f32 %v261_v22, 0.0 }
 0x11d   :  { %321 = vst.msk [vmem:[%s642_s5 + $0x10] sm:$0xff] %vm318_vm2, %v304_v23 }
 0x120   :  { %v263_v24 = vpop.f32.mrf.mxu1 }
 0x121   :  { %v264_v25 = vadd.f32 %v555_v14, %v263_v24 }
 0x123   :  { %v305_v26 = vmax.f32 %v264_v25, 0.0 }
 0x125   :  { %322 = vst.msk [vmem:[%s642_s5 + $0x18] sm:$0xff] %vm318_vm2, %v305_v26 }
 0x128   :  { %v266_v27 = vpop.f32.mrf.mxu1 }
 0x129   :  { %v267_v28 = vadd.f32 %v555_v14, %v266_v27 }
 0x12b   :  { %v306_v29 = vmax.f32 %v267_v28, 0.0 }
 0x12d   :  { %323 = vst.msk [vmem:[%s642_s5 + $0x20] sm:$0xff] %vm318_vm2, %v306_v29 }
 0x130   :  { %v269_v30 = vpop.f32.mrf.mxu1 }
 0x131   :  { %v270_v31 = vadd.f32 %v555_v14, %v269_v30 }
 0x133   :  { %v307_v32 = vmax.f32 %v270_v31, 0.0 }
 0x135   :  { %324 = vst.msk [vmem:[%s642_s5 + $0x28] sm:$0xff] %vm318_vm2, %v307_v32 }
 0x138   :  { %v272_v33 = vpop.f32.mrf.mxu1 }
 0x139   :  { %v273_v34 = vadd.f32 %v555_v14, %v272_v33 }
 0x13b   :  { %v308_v35 = vmax.f32 %v273_v34, 0.0 }
 0x13d   :  { %325 = vst.msk [vmem:[%s642_s5 + $0x30] sm:$0xff] %vm318_vm2, %v308_v35 }
 0x140   :  { %v275_v36 = vpop.f32.mrf.mxu1 }
 0x141   :  { %v276_v37 = vadd.f32 %v555_v14, %v275_v36 }
 0x143   :  { %v309_v38 = vmax.f32 %v276_v37, 0.0 }
 0x145   :  { %326 = vst.msk [vmem:[%s642_s5 + $0x38] sm:$0xff] %vm318_vm2, %v309_v38 }
 0x14e   :  { %v278_v39 = vpop.f32.mrf.mxu2 }
 0x14f   :  { %v279_v40 = vadd.f32 %v555_v14, %v278_v39 }
 0x151   :  { %v310_v41 = vmax.f32 %v279_v40, 0.0 }
 0x153   :  { %327 = vst.msk [vmem:[%s642_s5 + $0x40] sm:$0xff] %vm318_vm2, %v310_v41 }
 0x156   :  { %v281_v42 = vpop.f32.mrf.mxu2 }
 0x157   :  { %v282_v43 = vadd.f32 %v555_v14, %v281_v42 }
 0x159   :  { %v311_v44 = vmax.f32 %v282_v43, 0.0 }
 0x15b   :  { %328 = vst.msk [vmem:[%s642_s5 + $0x48] sm:$0xff] %vm318_vm2, %v311_v44 }
 0x15e   :  { %v284_v45 = vpop.f32.mrf.mxu2 }
 0x15f   :  { %v285_v46 = vadd.f32 %v555_v14, %v284_v45 }
 0x161   :  { %v312_v47 = vmax.f32 %v285_v46, 0.0 }
 0x163   :  { %329 = vst.msk [vmem:[%s642_s5 + $0x50] sm:$0xff] %vm318_vm2, %v312_v47 }
 0x166   :  { %v287_v48 = vpop.f32.mrf.mxu2 }
 0x167   :  { %v288_v49 = vadd.f32 %v555_v14, %v287_v48 }
 0x169   :  { %v313_v50 = vmax.f32 %v288_v49, 0.0 }
 0x16b   :  { %330 = vst.msk [vmem:[%s642_s5 + $0x58] sm:$0xff] %vm318_vm2, %v313_v50 }
 0x16e   :  { %v290_v51 = vpop.f32.mrf.mxu2 }
 0x16f   :  { %v291_v52 = vadd.f32 %v555_v14, %v290_v51 }
 0x171   :  { %v314_v53 = vmax.f32 %v291_v52, 0.0 }
 0x173   :  { %331 = vst.msk [vmem:[%s642_s5 + $0x60] sm:$0xff] %vm318_vm2, %v314_v53 }
 0x176   :  { %v293_v54 = vpop.f32.mrf.mxu2 }
 0x177   :  { %v294_v55 = vadd.f32 %v555_v14, %v293_v54 }
 0x179   :  { %v315_v56 = vmax.f32 %v294_v55, 0.0 }
 0x17b   :  { %332 = vst.msk [vmem:[%s642_s5 + $0x68] sm:$0xff] %vm318_vm2, %v315_v56 }
 0x17e   :  { %v296_v57 = vpop.f32.mrf.mxu2 }
 0x17f   :  { %v297_v58 = vadd.f32 %v555_v14, %v296_v57 }
 0x181   :  { %v316_v59 = vmax.f32 %v297_v58, 0.0 }
 0x183   :  { %333 = vst.msk [vmem:[%s642_s5 + $0x70] sm:$0xff] %vm318_vm2, %v316_v59 }
 0x186   :  { %v299_v60 = vpop.f32.mrf.mxu2 }
 0x187   :  { %v300_v61 = vadd.f32 %v555_v14, %v299_v60 }
 0x189   :  { %v317_v62 = vmax.f32 %v300_v61, 0.0 }
 0x18b   :  { %334 = vst.msk [vmem:[%s642_s5 + $0x78] sm:$0xff] %vm318_vm2, %v317_v62 }

</bundles_post_ra>
